<compile_context>
chip_gen: v5e
topology: v5e:2x2
jax: 0.10.0
libtpu: 0.0.40
codegen_flags: <defaults>
</compile_context>

<pallas_src>
import functools

import jax
import jax.numpy as jnp
import numpy as np
from jax import lax
from jax.experimental import pallas as pl
from jax.experimental.pallas import tpu as pltpu

NEG_SLOPE = 0.2  # LeakyReLU(0.2)

# tap order matches the weight packing: t = (dy+1)*3 + (dx+1) == ky*3 + kx
_TAPS = tuple((dy, dx) for dy in (-1, 0, 1) for dx in (-1, 0, 1))


def _leaky(x):
    return jnp.where(x > 0, x, NEG_SLOPE * x)


def _is_pow2(n):
    return n > 0 and (n & (n - 1)) == 0


def _mod_const(x, m):
    return (x & (m - 1)) if _is_pow2(m) else x % m


def _div_const(x, m):
    return (x >> (m.bit_length() - 1)) if _is_pow2(m) else x // m


def _base_masks(L, H, W):
    """4 per-image boundary masks, shape (1, L) bool.

    Batch is folded onto the lane axis, so coordinates are computed per image:
    h = (lane % (H*W)) // W, w = lane % W.  Only these 4 masks stay live; the
    per-tap combination is AND'ed on the fly (cuts im2col vreg pressure)."""
    HW = H * W
    lane = lax.broadcasted_iota(jnp.int32, (1, L), 1)
    intra = _mod_const(lane, HW)
    h = _div_const(intra, W)
    w = _mod_const(intra, W)
    return (h >= 1, h <= H - 2, w >= 1, w <= W - 2)


def _conv3x3(x, w_ref, b, col_ref, H, W, masks):
    """3x3 'same' conv on x:(Cin, L) with packed weights w_ref:(Cout, 9*Cin).

    In-register im2col: 9 lane rotations (XLU) + boundary masks; each tap is
    written straight into the (9*Cin, L) VMEM scratch slab, then a single MXU
    matmul with K = 9*Cin, N = L."""
    Cin, L = x.shape
    m_hm1, m_hp1, m_wm1, m_wp1 = masks
    for t, (dy, dx) in enumerate(_TAPS):
        s = dy * W + dx                          # flat shift of this tap
        tap = x if s == 0 else pltpu.roll(x, shift=(-s) % L, axis=1)
        mask = None
        if dy == -1:
            mask = m_hm1
        elif dy == 1:
            mask = m_hp1
        if dx == -1:
            mask = m_wm1 if mask is None else (mask & m_wm1)
        elif dx == 1:
            mask = m_wp1 if mask is None else (mask & m_wp1)
        if mask is not None:
            tap = jnp.where(mask, tap, 0.0)
        col_ref[t * Cin:(t + 1) * Cin, :] = tap.astype(col_ref.dtype)
    return jnp.dot(w_ref[...], col_ref[...],
                   preferred_element_type=jnp.float32) + b


def _sft_kernel(w_ref,                      # (1, 1) scalar w in SMEM
                cat_ref, dec_ref,           # (Cc+Cd, L) / (Cd, L)
                w1_ref, b1_ref,             # 1x1 conv (mid, Cc+Cd), (mid, 1)
                w2_ref, b2_ref,             # 3x3 mid->mid packed (mid, 9*mid)
                wss_ref, bss_ref,           # fused scale|shift head (2*g, 9*mid)
                out_ref,                    # (Cd, L)
                col_ref,                    # VMEM scratch (9*mid, L) im2col slab
                *, H, W, mxu_dtype):
    dec = dec_ref[...].astype(jnp.float32)          # (Cd, L)
    Cd, L = dec.shape
    g = wss_ref.shape[0] // 2                       # sublane-group stride of the head

    masks = _base_masks(L, H, W)                    # shared by both 3x3 convs

    # --- 1x1 conv on cat([cond, dec], ch): single MXU matmul + LeakyReLU
    cat = cat_ref[...]
    if cat.dtype != mxu_dtype:
        cat = cat.astype(mxu_dtype)
    t = _leaky(jnp.dot(w1_ref[...], cat, preferred_element_type=jnp.float32)
               + b1_ref[...])                       # (mid, L) f32

    # --- fuse_layer second conv (3x3, mid->mid) + LeakyReLU
    fuse = _leaky(_conv3x3(t, w2_ref, b2_ref[...], col_ref, H, W, masks))

    # --- fused SFT heads: scale rows [0, Cd), shift rows [g, g+Cd) (aligned groups)
    ss = _conv3x3(fuse, wss_ref, bss_ref[...], col_ref, H, W, masks)
    scale = ss[:Cd, :]
    shift = ss[g:g + Cd, :]

    wv = w_ref[0, 0]
    out_ref[...] = (dec + wv * (dec * scale + shift)).astype(out_ref.dtype)


def pack_params(params, cond_ch, dec_ch, mxu_dtype=jnp.float32):
    """One-time weight packing — call once, OUTSIDE the per-step hot path."""
    mid = int(params["b1"].shape[0])
    g = 8 * ((dec_ch + 7) // 8)                     # pad head rows to 8-sublane groups

    def pack3x3(w):                                 # OIHW -> (O, 9*I); row = ky*3+kx
        return jnp.transpose(w, (0, 2, 3, 1)).reshape(w.shape[0], 9 * w.shape[1])

    wss = jnp.zeros((2 * g, 9 * mid), jnp.float32)
    wss = wss.at[:dec_ch].set(pack3x3(params["w_scale"]))
    wss = wss.at[g:g + dec_ch].set(pack3x3(params["w_shift"]))
    bss = jnp.zeros((2 * g, 1), jnp.float32)
    bss = bss.at[:dec_ch, 0].set(params["b_scale"])
    bss = bss.at[g:g + dec_ch, 0].set(params["b_shift"])

    packed = {
        "w1": params["w1"][:, :, 0, 0].astype(mxu_dtype),        # (mid, Cc+Cd)
        "b1": params["b1"].reshape(mid, 1).astype(jnp.float32),
        "w2": pack3x3(params["w2"]).astype(mxu_dtype),           # (mid, 9*mid)
        "b2": params["b2"].reshape(mid, 1).astype(jnp.float32),
        "wss": wss.astype(mxu_dtype),                            # (2*g, 9*mid)
        "bss": bss,                                              # (2*g, 1) f32
    }
    return jax.tree_util.tree_map(jax.device_put, packed)


@functools.partial(jax.jit, static_argnames=("n_chunks", "mxu_dtype"))
def light_fuse_sft(dec_feat, cond_feat, packed, w, *,
                   n_chunks=1, mxu_dtype=jnp.float32):
    """dec_feat: (N, Cd, H, W), cond_feat: (N, Cc, H, W)  -- NCHW like PyTorch."""
    N, Cd, H, W = dec_feat.shape
    Cc = cond_feat.shape[1]
    mid = packed["b1"].shape[0]
    g2 = packed["wss"].shape[0]
    HW = H * W
    assert N % n_chunks == 0, "n_chunks must divide the batch"
    L = N * HW                                  # total lanes (batch folded on lanes)
    Lc = (N // n_chunks) * HW                   # lanes per grid step (whole images)

    # layout plumbing: spatial*batch on lanes, channels on sublanes
    dec_t = jnp.transpose(dec_feat.reshape(N, Cd, HW), (1, 0, 2)).reshape(Cd, L)
    cond_t = jnp.transpose(cond_feat.reshape(N, Cc, HW), (1, 0, 2)).reshape(Cc, L)
    cat_t = jnp.concatenate([cond_t, dec_t], axis=0)     # (Cc+Cd, L)
    w_arr = jnp.asarray(w, jnp.float32).reshape(1, 1)

    grid_spec = pltpu.PrefetchScalarGridSpec(
        num_scalar_prefetch=0,
        grid=(n_chunks,),
        in_specs=[
            pl.BlockSpec(memory_space=pltpu.MemorySpace.SMEM),    # w scalar
            pl.BlockSpec((Cc + Cd, Lc), lambda n: (0, n)),        # cat([cond, dec])
            pl.BlockSpec((Cd, Lc), lambda n: (0, n)),             # dec
            pl.BlockSpec((mid, Cc + Cd), lambda n: (0, 0)),       # w1
            pl.BlockSpec((mid, 1), lambda n: (0, 0)),             # b1
            pl.BlockSpec((mid, 9 * mid), lambda n: (0, 0)),       # w2 packed
            pl.BlockSpec((mid, 1), lambda n: (0, 0)),             # b2
            pl.BlockSpec((g2, 9 * mid), lambda n: (0, 0)),        # scale|shift packed
            pl.BlockSpec((g2, 1), lambda n: (0, 0)),              # scale|shift bias
        ],
        out_specs=pl.BlockSpec((Cd, Lc), lambda n: (0, n)),
        scratch_shapes=[pltpu.VMEM((9 * mid, Lc), mxu_dtype)],    # im2col slab
    )
    out_flat = pl.pallas_call(
        functools.partial(_sft_kernel, H=H, W=W, mxu_dtype=mxu_dtype),
        out_shape=jax.ShapeDtypeStruct((Cd, L), dec_feat.dtype),
        grid_spec=grid_spec,
        compiler_params=pltpu.CompilerParams(dimension_semantics=("parallel",)),
    )(w_arr, cat_t, dec_t, packed["w1"], packed["b1"], packed["w2"],
      packed["b2"], packed["wss"], packed["bss"])
    return jnp.transpose(out_flat.reshape(Cd, N, HW), (1, 0, 2)).reshape(N, Cd, H, W)


def _device_config(N, HW):
    """Per-generation knobs: grid steps (2 on v7x to feed both TCs, else 1 big
    step) and MXU operand dtype (bf16 on v6e/v7x, f32 on v5e)."""
    try:
        kind = jax.devices()[0].device_kind.lower()
    except Exception:
        kind = ""
    gen7 = ("v7" in kind) or ("tpu7" in kind)
    gen6 = ("v6" in kind) or ("tpu6" in kind) or ("trillium" in kind)
    n_chunks = 2 if (gen7 and N % 2 == 0 and ((N // 2) * HW) % 128 == 0) else 1
    mxu_dtype = jnp.bfloat16 if (gen6 or gen7) else jnp.float32
    return n_chunks, mxu_dtype


# ----------------------------- pure-JAX reference -----------------------------
def _ref_conv(x, w_oihw, b, pad):
    y = lax.conv_general_dilated(
        x, w_oihw, window_strides=(1, 1), padding=[(pad, pad), (pad, pad)],
        dimension_numbers=("NCHW", "OIHW", "NCHW"))
    return y + b.reshape(1, -1, 1, 1)


def ref_forward(dec, cond, params, w):
    x = jnp.concatenate([cond, dec], axis=1)
    t = _leaky(_ref_conv(x, params["w1"], params["b1"], 0))
    fuse = _leaky(_ref_conv(t, params["w2"], params["b2"], 1))
    scale = _ref_conv(fuse, params["w_scale"], params["b_scale"], 1)
    shift = _ref_conv(fuse, params["w_shift"], params["b_shift"], 1)
    return dec + w * (dec * scale + shift)


def init_params(key, cond_ch, dec_ch, mid_ch):
    ks = jax.random.split(key, 8)
    s = 0.1
    return {
        "w1": jax.random.normal(ks[0], (mid_ch, cond_ch + dec_ch, 1, 1), jnp.float32) * s,
        "b1": jax.random.normal(ks[1], (mid_ch,), jnp.float32) * s,
        "w2": jax.random.normal(ks[2], (mid_ch, mid_ch, 3, 3), jnp.float32) * s,
        "b2": jax.random.normal(ks[3], (mid_ch,), jnp.float32) * s,
        "w_scale": jax.random.normal(ks[4], (dec_ch, mid_ch, 3, 3), jnp.float32) * s,
        "b_scale": jax.random.normal(ks[5], (dec_ch,), jnp.float32) * s,
        "w_shift": jax.random.normal(ks[6], (dec_ch, mid_ch, 3, 3), jnp.float32) * s,
        "b_shift": jax.random.normal(ks[7], (dec_ch,), jnp.float32) * s,
    }


if __name__ == "__main__":
    N, H, W = 2, 16, 16
    cond_ch, dec_ch, mid_ch = 4, 4, 8
    w_blend = 0.75

    key = jax.random.PRNGKey(0)
    k_dec, k_cond, k_par = jax.random.split(key, 3)
    dec_feat = jax.random.normal(k_dec, (N, dec_ch, H, W), jnp.float32)   # NCHW
    cond_feat = jax.random.normal(k_cond, (N, cond_ch, H, W), jnp.float32)
    params = init_params(k_par, cond_ch, dec_ch, mid_ch)

    n_chunks, mxu_dtype = _device_config(N, H * W)
    packed = pack_params(params, cond_ch, dec_ch, mxu_dtype)   # one-time packing

    out = jax.block_until_ready(
        light_fuse_sft(dec_feat, cond_feat, packed, w_blend,
                       n_chunks=n_chunks, mxu_dtype=mxu_dtype))
    ref = jax.block_until_ready(ref_forward(dec_feat, cond_feat, params, w_blend))

    tol = 3e-2 if mxu_dtype == jnp.bfloat16 else 2e-3
    np.testing.assert_allclose(np.asarray(out), np.asarray(ref), rtol=tol, atol=tol)

    print("KERNEL_OK")
</pallas_src>

<mosaic_0001>
module attributes {stable_mosaic.version = 11 : i64} {
  func.func @_sft_kernel(%arg0: i32, %arg1: memref<1x1xf32, #tpu.memory_space<smem>>, %arg2: memref<8x512xf32, #tpu.memory_space<vmem>>, %arg3: memref<4x512xf32, #tpu.memory_space<vmem>>, %arg4: memref<8x8xf32, #tpu.memory_space<vmem>>, %arg5: memref<8x1xf32, #tpu.memory_space<vmem>>, %arg6: memref<8x72xf32, #tpu.memory_space<vmem>>, %arg7: memref<8x1xf32, #tpu.memory_space<vmem>>, %arg8: memref<16x72xf32, #tpu.memory_space<vmem>>, %arg9: memref<16x1xf32, #tpu.memory_space<vmem>>, %arg10: memref<4x512xf32, #tpu.memory_space<vmem>>, %arg11: memref<72x512xf32, #tpu.memory_space<vmem>>) attributes {dimension_semantics = [#tpu.dimension_semantics<parallel>], iteration_bounds = array<i64: 1>, scalar_prefetch = 0 : i64, scratch_operands = 1 : i64, tpu.core_type = #tpu.core_type<tc>, window_params = [{transform_indices = @transform_0, window_bounds = array<i64: 1, 1>}, {transform_indices = @transform_1, window_bounds = array<i64: 8, 512>}, {transform_indices = @transform_2, window_bounds = array<i64: 4, 512>}, {pipeline_mode = #tpu.pipeline_mode<synchronous>, transform_indices = @transform_3, window_bounds = array<i64: 8, 8>}, {pipeline_mode = #tpu.pipeline_mode<synchronous>, transform_indices = @transform_4, window_bounds = array<i64: 8, 1>}, {pipeline_mode = #tpu.pipeline_mode<synchronous>, transform_indices = @transform_5, window_bounds = array<i64: 8, 72>}, {pipeline_mode = #tpu.pipeline_mode<synchronous>, transform_indices = @transform_6, window_bounds = array<i64: 8, 1>}, {pipeline_mode = #tpu.pipeline_mode<synchronous>, transform_indices = @transform_7, window_bounds = array<i64: 16, 72>}, {pipeline_mode = #tpu.pipeline_mode<synchronous>, transform_indices = @transform_8, window_bounds = array<i64: 16, 1>}, {transform_indices = @transform_9, window_bounds = array<i64: 4, 512>}]} {
    %c0 = arith.constant 0 : index
    %c0_0 = arith.constant 0 : index
    %0 = vector.load %arg3[%c0, %c0_0] : memref<4x512xf32, #tpu.memory_space<vmem>>, vector<4x512xf32>
    %1 = tpu.iota {dimensions = array<i32: 1>} : vector<1x512xi32>
    %c255_i32 = arith.constant 255 : i32
    %2 = vector.broadcast %c255_i32 : i32 to vector<1x512xi32>
    %3 = arith.andi %1, %2 : vector<1x512xi32>
    %c4_i32 = arith.constant 4 : i32
    %4 = vector.broadcast %c4_i32 : i32 to vector<1x512xi32>
    %5 = arith.shrsi %3, %4 : vector<1x512xi32>
    %c15_i32 = arith.constant 15 : i32
    %6 = vector.broadcast %c15_i32 : i32 to vector<1x512xi32>
    %7 = arith.andi %3, %6 : vector<1x512xi32>
    %c1_i32 = arith.constant 1 : i32
    %8 = vector.broadcast %c1_i32 : i32 to vector<1x512xi32>
    %9 = arith.cmpi sge, %5, %8 : vector<1x512xi32>
    %c14_i32 = arith.constant 14 : i32
    %10 = vector.broadcast %c14_i32 : i32 to vector<1x512xi32>
    %11 = arith.cmpi sle, %5, %10 : vector<1x512xi32>
    %c1_i32_1 = arith.constant 1 : i32
    %12 = vector.broadcast %c1_i32_1 : i32 to vector<1x512xi32>
    %13 = arith.cmpi sge, %7, %12 : vector<1x512xi32>
    %c14_i32_2 = arith.constant 14 : i32
    %14 = vector.broadcast %c14_i32_2 : i32 to vector<1x512xi32>
    %15 = arith.cmpi sle, %7, %14 : vector<1x512xi32>
    %c0_3 = arith.constant 0 : index
    %c0_4 = arith.constant 0 : index
    %16 = vector.load %arg2[%c0_3, %c0_4] : memref<8x512xf32, #tpu.memory_space<vmem>>, vector<8x512xf32>
    %c0_5 = arith.constant 0 : index
    %c0_6 = arith.constant 0 : index
    %17 = vector.load %arg4[%c0_5, %c0_6] : memref<8x8xf32, #tpu.memory_space<vmem>>, vector<8x8xf32>
    %cst = arith.constant dense<0.000000e+00> : vector<8x512xf32>
    %18 = tpu.matmul %17, %16, %cst {dimension_numbers = #tpu.dot_dimension_numbers<[1], [0], [0], [1], [0, 0, 1, 1], [], []>} : vector<8x8xf32>, vector<8x512xf32>, vector<8x512xf32> -> vector<8x512xf32>
    %c0_7 = arith.constant 0 : index
    %c0_8 = arith.constant 0 : index
    %19 = vector.load %arg5[%c0_7, %c0_8] : memref<8x1xf32, #tpu.memory_space<vmem>>, vector<8x1xf32>
    %20 = vector.broadcast %19 : vector<8x1xf32> to vector<8x512xf32>
    %21 = arith.addf %18, %20 : vector<8x512xf32>
    %cst_9 = arith.constant 0.000000e+00 : f32
    %22 = vector.broadcast %cst_9 : f32 to vector<8x512xf32>
    %23 = arith.cmpf ogt, %21, %22 : vector<8x512xf32>
    %cst_10 = arith.constant 2.000000e-01 : f32
    %24 = vector.broadcast %cst_10 : f32 to vector<8x512xf32>
    %25 = arith.mulf %24, %21 : vector<8x512xf32>
    %26 = arith.select %23, %21, %25 : vector<8x512xi1>, vector<8x512xf32>
    %c0_11 = arith.constant 0 : index
    %c0_12 = arith.constant 0 : index
    %27 = vector.load %arg7[%c0_11, %c0_12] : memref<8x1xf32, #tpu.memory_space<vmem>>, vector<8x1xf32>
    %c17_i32 = arith.constant 17 : i32
    %28 = tpu.dynamic_rotate %26 by %c17_i32 dim 1 : vector<8x512xf32>, i32 -> vector<8x512xf32>
    %29 = arith.andi %9, %13 : vector<1x512xi1>
    %cst_13 = arith.constant 0.000000e+00 : f32
    %30 = vector.shape_cast %29 : vector<1x512xi1> to vector<1x512xi1>
    %31 = vector.broadcast %30 : vector<1x512xi1> to vector<8x512xi1>
    %32 = vector.broadcast %cst_13 : f32 to vector<8x512xf32>
    %33 = arith.select %31, %28, %32 : vector<8x512xi1>, vector<8x512xf32>
    %c0_14 = arith.constant 0 : index
    %c0_15 = arith.constant 0 : index
    %34 = vector.load %arg11[%c0_14, %c0_15] : memref<72x512xf32, #tpu.memory_space<vmem>>, vector<8x512xf32>
    tpu.vector_store %arg11[%c0_14, %c0_15], %33 {strides = array<i32>} : memref<72x512xf32, #tpu.memory_space<vmem>>, vector<8x512xf32>,
    %c16_i32 = arith.constant 16 : i32
    %35 = tpu.dynamic_rotate %26 by %c16_i32 dim 1 : vector<8x512xf32>, i32 -> vector<8x512xf32>
    %cst_16 = arith.constant 0.000000e+00 : f32
    %36 = vector.shape_cast %9 : vector<1x512xi1> to vector<1x512xi1>
    %37 = vector.broadcast %36 : vector<1x512xi1> to vector<8x512xi1>
    %38 = vector.broadcast %cst_16 : f32 to vector<8x512xf32>
    %39 = arith.select %37, %35, %38 : vector<8x512xi1>, vector<8x512xf32>
    %c8 = arith.constant 8 : index
    %c0_17 = arith.constant 0 : index
    %40 = vector.load %arg11[%c8, %c0_17] : memref<72x512xf32, #tpu.memory_space<vmem>>, vector<8x512xf32>
    tpu.vector_store %arg11[%c8, %c0_17], %39 {strides = array<i32>} : memref<72x512xf32, #tpu.memory_space<vmem>>, vector<8x512xf32>,
    %c15_i32_18 = arith.constant 15 : i32
    %41 = tpu.dynamic_rotate %26 by %c15_i32_18 dim 1 : vector<8x512xf32>, i32 -> vector<8x512xf32>
    %42 = arith.andi %9, %15 : vector<1x512xi1>
    %cst_19 = arith.constant 0.000000e+00 : f32
    %43 = vector.shape_cast %42 : vector<1x512xi1> to vector<1x512xi1>
    %44 = vector.broadcast %43 : vector<1x512xi1> to vector<8x512xi1>
    %45 = vector.broadcast %cst_19 : f32 to vector<8x512xf32>
    %46 = arith.select %44, %41, %45 : vector<8x512xi1>, vector<8x512xf32>
    %c16 = arith.constant 16 : index
    %c0_20 = arith.constant 0 : index
    %47 = vector.load %arg11[%c16, %c0_20] : memref<72x512xf32, #tpu.memory_space<vmem>>, vector<8x512xf32>
    tpu.vector_store %arg11[%c16, %c0_20], %46 {strides = array<i32>} : memref<72x512xf32, #tpu.memory_space<vmem>>, vector<8x512xf32>,
    %c1_i32_21 = arith.constant 1 : i32
    %48 = tpu.dynamic_rotate %26 by %c1_i32_21 dim 1 : vector<8x512xf32>, i32 -> vector<8x512xf32>
    %cst_22 = arith.constant 0.000000e+00 : f32
    %49 = vector.shape_cast %13 : vector<1x512xi1> to vector<1x512xi1>
    %50 = vector.broadcast %49 : vector<1x512xi1> to vector<8x512xi1>
    %51 = vector.broadcast %cst_22 : f32 to vector<8x512xf32>
    %52 = arith.select %50, %48, %51 : vector<8x512xi1>, vector<8x512xf32>
    %c24 = arith.constant 24 : index
    %c0_23 = arith.constant 0 : index
    %53 = vector.load %arg11[%c24, %c0_23] : memref<72x512xf32, #tpu.memory_space<vmem>>, vector<8x512xf32>
    tpu.vector_store %arg11[%c24, %c0_23], %52 {strides = array<i32>} : memref<72x512xf32, #tpu.memory_space<vmem>>, vector<8x512xf32>,
    %c32 = arith.constant 32 : index
    %c0_24 = arith.constant 0 : index
    %54 = vector.load %arg11[%c32, %c0_24] : memref<72x512xf32, #tpu.memory_space<vmem>>, vector<8x512xf32>
    tpu.vector_store %arg11[%c32, %c0_24], %26 {strides = array<i32>} : memref<72x512xf32, #tpu.memory_space<vmem>>, vector<8x512xf32>,
    %c511_i32 = arith.constant 511 : i32
    %55 = tpu.dynamic_rotate %26 by %c511_i32 dim 1 : vector<8x512xf32>, i32 -> vector<8x512xf32>
    %cst_25 = arith.constant 0.000000e+00 : f32
    %56 = vector.shape_cast %15 : vector<1x512xi1> to vector<1x512xi1>
    %57 = vector.broadcast %56 : vector<1x512xi1> to vector<8x512xi1>
    %58 = vector.broadcast %cst_25 : f32 to vector<8x512xf32>
    %59 = arith.select %57, %55, %58 : vector<8x512xi1>, vector<8x512xf32>
    %c40 = arith.constant 40 : index
    %c0_26 = arith.constant 0 : index
    %60 = vector.load %arg11[%c40, %c0_26] : memref<72x512xf32, #tpu.memory_space<vmem>>, vector<8x512xf32>
    tpu.vector_store %arg11[%c40, %c0_26], %59 {strides = array<i32>} : memref<72x512xf32, #tpu.memory_space<vmem>>, vector<8x512xf32>,
    %c497_i32 = arith.constant 497 : i32
    %61 = tpu.dynamic_rotate %26 by %c497_i32 dim 1 : vector<8x512xf32>, i32 -> vector<8x512xf32>
    %62 = arith.andi %11, %13 : vector<1x512xi1>
    %cst_27 = arith.constant 0.000000e+00 : f32
    %63 = vector.shape_cast %62 : vector<1x512xi1> to vector<1x512xi1>
    %64 = vector.broadcast %63 : vector<1x512xi1> to vector<8x512xi1>
    %65 = vector.broadcast %cst_27 : f32 to vector<8x512xf32>
    %66 = arith.select %64, %61, %65 : vector<8x512xi1>, vector<8x512xf32>
    %c48 = arith.constant 48 : index
    %c0_28 = arith.constant 0 : index
    %67 = vector.load %arg11[%c48, %c0_28] : memref<72x512xf32, #tpu.memory_space<vmem>>, vector<8x512xf32>
    tpu.vector_store %arg11[%c48, %c0_28], %66 {strides = array<i32>} : memref<72x512xf32, #tpu.memory_space<vmem>>, vector<8x512xf32>,
    %c496_i32 = arith.constant 496 : i32
    %68 = tpu.dynamic_rotate %26 by %c496_i32 dim 1 : vector<8x512xf32>, i32 -> vector<8x512xf32>
    %cst_29 = arith.constant 0.000000e+00 : f32
    %69 = vector.shape_cast %11 : vector<1x512xi1> to vector<1x512xi1>
    %70 = vector.broadcast %69 : vector<1x512xi1> to vector<8x512xi1>
    %71 = vector.broadcast %cst_29 : f32 to vector<8x512xf32>
    %72 = arith.select %70, %68, %71 : vector<8x512xi1>, vector<8x512xf32>
    %c56 = arith.constant 56 : index
    %c0_30 = arith.constant 0 : index
    %73 = vector.load %arg11[%c56, %c0_30] : memref<72x512xf32, #tpu.memory_space<vmem>>, vector<8x512xf32>
    tpu.vector_store %arg11[%c56, %c0_30], %72 {strides = array<i32>} : memref<72x512xf32, #tpu.memory_space<vmem>>, vector<8x512xf32>,
    %c495_i32 = arith.constant 495 : i32
    %74 = tpu.dynamic_rotate %26 by %c495_i32 dim 1 : vector<8x512xf32>, i32 -> vector<8x512xf32>
    %75 = arith.andi %11, %15 : vector<1x512xi1>
    %cst_31 = arith.constant 0.000000e+00 : f32
    %76 = vector.shape_cast %75 : vector<1x512xi1> to vector<1x512xi1>
    %77 = vector.broadcast %76 : vector<1x512xi1> to vector<8x512xi1>
    %78 = vector.broadcast %cst_31 : f32 to vector<8x512xf32>
    %79 = arith.select %77, %74, %78 : vector<8x512xi1>, vector<8x512xf32>
    %c64 = arith.constant 64 : index
    %c0_32 = arith.constant 0 : index
    %80 = vector.load %arg11[%c64, %c0_32] : memref<72x512xf32, #tpu.memory_space<vmem>>, vector<8x512xf32>
    tpu.vector_store %arg11[%c64, %c0_32], %79 {strides = array<i32>} : memref<72x512xf32, #tpu.memory_space<vmem>>, vector<8x512xf32>,
    %c0_33 = arith.constant 0 : index
    %c0_34 = arith.constant 0 : index
    %81 = vector.load %arg6[%c0_33, %c0_34] : memref<8x72xf32, #tpu.memory_space<vmem>>, vector<8x72xf32>
    %c0_35 = arith.constant 0 : index
    %c0_36 = arith.constant 0 : index
    %82 = vector.load %arg11[%c0_35, %c0_36] : memref<72x512xf32, #tpu.memory_space<vmem>>, vector<72x512xf32>
    %cst_37 = arith.constant dense<0.000000e+00> : vector<8x512xf32>
    %83 = tpu.matmul %81, %82, %cst_37 {dimension_numbers = #tpu.dot_dimension_numbers<[1], [0], [0], [1], [0, 0, 1, 1], [], []>} : vector<8x72xf32>, vector<72x512xf32>, vector<8x512xf32> -> vector<8x512xf32>
    %84 = vector.broadcast %27 : vector<8x1xf32> to vector<8x512xf32>
    %85 = arith.addf %83, %84 : vector<8x512xf32>
    %cst_38 = arith.constant 0.000000e+00 : f32
    %86 = vector.broadcast %cst_38 : f32 to vector<8x512xf32>
    %87 = arith.cmpf ogt, %85, %86 : vector<8x512xf32>
    %cst_39 = arith.constant 2.000000e-01 : f32
    %88 = vector.broadcast %cst_39 : f32 to vector<8x512xf32>
    %89 = arith.mulf %88, %85 : vector<8x512xf32>
    %90 = arith.select %87, %85, %89 : vector<8x512xi1>, vector<8x512xf32>
    %c0_40 = arith.constant 0 : index
    %c0_41 = arith.constant 0 : index
    %91 = vector.load %arg9[%c0_40, %c0_41] : memref<16x1xf32, #tpu.memory_space<vmem>>, vector<16x1xf32>
    %c17_i32_42 = arith.constant 17 : i32
    %92 = tpu.dynamic_rotate %90 by %c17_i32_42 dim 1 : vector<8x512xf32>, i32 -> vector<8x512xf32>
    %93 = arith.andi %9, %13 : vector<1x512xi1>
    %cst_43 = arith.constant 0.000000e+00 : f32
    %94 = vector.shape_cast %93 : vector<1x512xi1> to vector<1x512xi1>
    %95 = vector.broadcast %94 : vector<1x512xi1> to vector<8x512xi1>
    %96 = vector.broadcast %cst_43 : f32 to vector<8x512xf32>
    %97 = arith.select %95, %92, %96 : vector<8x512xi1>, vector<8x512xf32>
    %c0_44 = arith.constant 0 : index
    %c0_45 = arith.constant 0 : index
    %98 = vector.load %arg11[%c0_44, %c0_45] : memref<72x512xf32, #tpu.memory_space<vmem>>, vector<8x512xf32>
    tpu.vector_store %arg11[%c0_44, %c0_45], %97 {strides = array<i32>} : memref<72x512xf32, #tpu.memory_space<vmem>>, vector<8x512xf32>,
    %c16_i32_46 = arith.constant 16 : i32
    %99 = tpu.dynamic_rotate %90 by %c16_i32_46 dim 1 : vector<8x512xf32>, i32 -> vector<8x512xf32>
    %cst_47 = arith.constant 0.000000e+00 : f32
    %100 = vector.shape_cast %9 : vector<1x512xi1> to vector<1x512xi1>
    %101 = vector.broadcast %100 : vector<1x512xi1> to vector<8x512xi1>
    %102 = vector.broadcast %cst_47 : f32 to vector<8x512xf32>
    %103 = arith.select %101, %99, %102 : vector<8x512xi1>, vector<8x512xf32>
    %c8_48 = arith.constant 8 : index
    %c0_49 = arith.constant 0 : index
    %104 = vector.load %arg11[%c8_48, %c0_49] : memref<72x512xf32, #tpu.memory_space<vmem>>, vector<8x512xf32>
    tpu.vector_store %arg11[%c8_48, %c0_49], %103 {strides = array<i32>} : memref<72x512xf32, #tpu.memory_space<vmem>>, vector<8x512xf32>,
    %c15_i32_50 = arith.constant 15 : i32
    %105 = tpu.dynamic_rotate %90 by %c15_i32_50 dim 1 : vector<8x512xf32>, i32 -> vector<8x512xf32>
    %106 = arith.andi %9, %15 : vector<1x512xi1>
    %cst_51 = arith.constant 0.000000e+00 : f32
    %107 = vector.shape_cast %106 : vector<1x512xi1> to vector<1x512xi1>
    %108 = vector.broadcast %107 : vector<1x512xi1> to vector<8x512xi1>
    %109 = vector.broadcast %cst_51 : f32 to vector<8x512xf32>
    %110 = arith.select %108, %105, %109 : vector<8x512xi1>, vector<8x512xf32>
    %c16_52 = arith.constant 16 : index
    %c0_53 = arith.constant 0 : index
    %111 = vector.load %arg11[%c16_52, %c0_53] : memref<72x512xf32, #tpu.memory_space<vmem>>, vector<8x512xf32>
    tpu.vector_store %arg11[%c16_52, %c0_53], %110 {strides = array<i32>} : memref<72x512xf32, #tpu.memory_space<vmem>>, vector<8x512xf32>,
    %c1_i32_54 = arith.constant 1 : i32
    %112 = tpu.dynamic_rotate %90 by %c1_i32_54 dim 1 : vector<8x512xf32>, i32 -> vector<8x512xf32>
    %cst_55 = arith.constant 0.000000e+00 : f32
    %113 = vector.shape_cast %13 : vector<1x512xi1> to vector<1x512xi1>
    %114 = vector.broadcast %113 : vector<1x512xi1> to vector<8x512xi1>
    %115 = vector.broadcast %cst_55 : f32 to vector<8x512xf32>
    %116 = arith.select %114, %112, %115 : vector<8x512xi1>, vector<8x512xf32>
    %c24_56 = arith.constant 24 : index
    %c0_57 = arith.constant 0 : index
    %117 = vector.load %arg11[%c24_56, %c0_57] : memref<72x512xf32, #tpu.memory_space<vmem>>, vector<8x512xf32>
    tpu.vector_store %arg11[%c24_56, %c0_57], %116 {strides = array<i32>} : memref<72x512xf32, #tpu.memory_space<vmem>>, vector<8x512xf32>,
    %c32_58 = arith.constant 32 : index
    %c0_59 = arith.constant 0 : index
    %118 = vector.load %arg11[%c32_58, %c0_59] : memref<72x512xf32, #tpu.memory_space<vmem>>, vector<8x512xf32>
    tpu.vector_store %arg11[%c32_58, %c0_59], %90 {strides = array<i32>} : memref<72x512xf32, #tpu.memory_space<vmem>>, vector<8x512xf32>,
    %c511_i32_60 = arith.constant 511 : i32
    %119 = tpu.dynamic_rotate %90 by %c511_i32_60 dim 1 : vector<8x512xf32>, i32 -> vector<8x512xf32>
    %cst_61 = arith.constant 0.000000e+00 : f32
    %120 = vector.shape_cast %15 : vector<1x512xi1> to vector<1x512xi1>
    %121 = vector.broadcast %120 : vector<1x512xi1> to vector<8x512xi1>
    %122 = vector.broadcast %cst_61 : f32 to vector<8x512xf32>
    %123 = arith.select %121, %119, %122 : vector<8x512xi1>, vector<8x512xf32>
    %c40_62 = arith.constant 40 : index
    %c0_63 = arith.constant 0 : index
    %124 = vector.load %arg11[%c40_62, %c0_63] : memref<72x512xf32, #tpu.memory_space<vmem>>, vector<8x512xf32>
    tpu.vector_store %arg11[%c40_62, %c0_63], %123 {strides = array<i32>} : memref<72x512xf32, #tpu.memory_space<vmem>>, vector<8x512xf32>,
    %c497_i32_64 = arith.constant 497 : i32
    %125 = tpu.dynamic_rotate %90 by %c497_i32_64 dim 1 : vector<8x512xf32>, i32 -> vector<8x512xf32>
    %126 = arith.andi %11, %13 : vector<1x512xi1>
    %cst_65 = arith.constant 0.000000e+00 : f32
    %127 = vector.shape_cast %126 : vector<1x512xi1> to vector<1x512xi1>
    %128 = vector.broadcast %127 : vector<1x512xi1> to vector<8x512xi1>
    %129 = vector.broadcast %cst_65 : f32 to vector<8x512xf32>
    %130 = arith.select %128, %125, %129 : vector<8x512xi1>, vector<8x512xf32>
    %c48_66 = arith.constant 48 : index
    %c0_67 = arith.constant 0 : index
    %131 = vector.load %arg11[%c48_66, %c0_67] : memref<72x512xf32, #tpu.memory_space<vmem>>, vector<8x512xf32>
    tpu.vector_store %arg11[%c48_66, %c0_67], %130 {strides = array<i32>} : memref<72x512xf32, #tpu.memory_space<vmem>>, vector<8x512xf32>,
    %c496_i32_68 = arith.constant 496 : i32
    %132 = tpu.dynamic_rotate %90 by %c496_i32_68 dim 1 : vector<8x512xf32>, i32 -> vector<8x512xf32>
    %cst_69 = arith.constant 0.000000e+00 : f32
    %133 = vector.shape_cast %11 : vector<1x512xi1> to vector<1x512xi1>
    %134 = vector.broadcast %133 : vector<1x512xi1> to vector<8x512xi1>
    %135 = vector.broadcast %cst_69 : f32 to vector<8x512xf32>
    %136 = arith.select %134, %132, %135 : vector<8x512xi1>, vector<8x512xf32>
    %c56_70 = arith.constant 56 : index
    %c0_71 = arith.constant 0 : index
    %137 = vector.load %arg11[%c56_70, %c0_71] : memref<72x512xf32, #tpu.memory_space<vmem>>, vector<8x512xf32>
    tpu.vector_store %arg11[%c56_70, %c0_71], %136 {strides = array<i32>} : memref<72x512xf32, #tpu.memory_space<vmem>>, vector<8x512xf32>,
    %c495_i32_72 = arith.constant 495 : i32
    %138 = tpu.dynamic_rotate %90 by %c495_i32_72 dim 1 : vector<8x512xf32>, i32 -> vector<8x512xf32>
    %139 = arith.andi %11, %15 : vector<1x512xi1>
    %cst_73 = arith.constant 0.000000e+00 : f32
    %140 = vector.shape_cast %139 : vector<1x512xi1> to vector<1x512xi1>
    %141 = vector.broadcast %140 : vector<1x512xi1> to vector<8x512xi1>
    %142 = vector.broadcast %cst_73 : f32 to vector<8x512xf32>
    %143 = arith.select %141, %138, %142 : vector<8x512xi1>, vector<8x512xf32>
    %c64_74 = arith.constant 64 : index
    %c0_75 = arith.constant 0 : index
    %144 = vector.load %arg11[%c64_74, %c0_75] : memref<72x512xf32, #tpu.memory_space<vmem>>, vector<8x512xf32>
    tpu.vector_store %arg11[%c64_74, %c0_75], %143 {strides = array<i32>} : memref<72x512xf32, #tpu.memory_space<vmem>>, vector<8x512xf32>,
    %c0_76 = arith.constant 0 : index
    %c0_77 = arith.constant 0 : index
    %145 = vector.load %arg8[%c0_76, %c0_77] : memref<16x72xf32, #tpu.memory_space<vmem>>, vector<16x72xf32>
    %c0_78 = arith.constant 0 : index
    %c0_79 = arith.constant 0 : index
    %146 = vector.load %arg11[%c0_78, %c0_79] : memref<72x512xf32, #tpu.memory_space<vmem>>, vector<72x512xf32>
    %cst_80 = arith.constant dense<0.000000e+00> : vector<16x512xf32>
    %147 = tpu.matmul %145, %146, %cst_80 {dimension_numbers = #tpu.dot_dimension_numbers<[1], [0], [0], [1], [0, 0, 1, 1], [], []>} : vector<16x72xf32>, vector<72x512xf32>, vector<16x512xf32> -> vector<16x512xf32>
    %148 = vector.broadcast %91 : vector<16x1xf32> to vector<16x512xf32>
    %149 = arith.addf %147, %148 : vector<16x512xf32>
    %150 = vector.extract_strided_slice %149 {offsets = [0, 0], sizes = [4, 512], strides = [1, 1]} : vector<16x512xf32> to vector<4x512xf32>
    %151 = vector.extract_strided_slice %149 {offsets = [8, 0], sizes = [4, 512], strides = [1, 1]} : vector<16x512xf32> to vector<4x512xf32>
    %c0_81 = arith.constant 0 : index
    %c0_82 = arith.constant 0 : index
    %152 = memref.load %arg1[%c0_81, %c0_82] : memref<1x1xf32, #tpu.memory_space<smem>>
    %153 = arith.mulf %0, %150 : vector<4x512xf32>
    %154 = arith.addf %153, %151 : vector<4x512xf32>
    %155 = vector.broadcast %152 : f32 to vector<4x512xf32>
    %156 = arith.mulf %155, %154 : vector<4x512xf32>
    %157 = arith.addf %0, %156 : vector<4x512xf32>
    %c0_83 = arith.constant 0 : index
    %c0_84 = arith.constant 0 : index
    %158 = vector.load %arg10[%c0_83, %c0_84] : memref<4x512xf32, #tpu.memory_space<vmem>>, vector<4x512xf32>
    tpu.vector_store %arg10[%c0_83, %c0_84], %157 {strides = array<i32>} : memref<4x512xf32, #tpu.memory_space<vmem>>, vector<4x512xf32>,
    return
  }
  func.func @transform_0(%arg0: i32) -> (i32, i32) {
    %c0_i32 = arith.constant 0 : i32
    %c0_i32_0 = arith.constant 0 : i32
    %c0_i32_1 = arith.constant 0 : i32
    return %c0_i32, %c0_i32_0 : i32, i32
  }
  func.func @transform_1(%arg0: i32) -> (i32, i32) {
    %c0_i32 = arith.constant 0 : i32
    %c0_i32_0 = arith.constant 0 : i32
    return %c0_i32, %arg0 : i32, i32
  }
  func.func @transform_2(%arg0: i32) -> (i32, i32) {
    %c0_i32 = arith.constant 0 : i32
    %c0_i32_0 = arith.constant 0 : i32
    return %c0_i32, %arg0 : i32, i32
  }
  func.func @transform_3(%arg0: i32) -> (i32, i32) {
    %c0_i32 = arith.constant 0 : i32
    %c0_i32_0 = arith.constant 0 : i32
    %c0_i32_1 = arith.constant 0 : i32
    return %c0_i32, %c0_i32_0 : i32, i32
  }
  func.func @transform_4(%arg0: i32) -> (i32, i32) {
    %c0_i32 = arith.constant 0 : i32
    %c0_i32_0 = arith.constant 0 : i32
    %c0_i32_1 = arith.constant 0 : i32
    return %c0_i32, %c0_i32_0 : i32, i32
  }
  func.func @transform_5(%arg0: i32) -> (i32, i32) {
    %c0_i32 = arith.constant 0 : i32
    %c0_i32_0 = arith.constant 0 : i32
    %c0_i32_1 = arith.constant 0 : i32
    return %c0_i32, %c0_i32_0 : i32, i32
  }
  func.func @transform_6(%arg0: i32) -> (i32, i32) {
    %c0_i32 = arith.constant 0 : i32
    %c0_i32_0 = arith.constant 0 : i32
    %c0_i32_1 = arith.constant 0 : i32
    return %c0_i32, %c0_i32_0 : i32, i32
  }
  func.func @transform_7(%arg0: i32) -> (i32, i32) {
    %c0_i32 = arith.constant 0 : i32
    %c0_i32_0 = arith.constant 0 : i32
    %c0_i32_1 = arith.constant 0 : i32
    return %c0_i32, %c0_i32_0 : i32, i32
  }
  func.func @transform_8(%arg0: i32) -> (i32, i32) {
    %c0_i32 = arith.constant 0 : i32
    %c0_i32_0 = arith.constant 0 : i32
    %c0_i32_1 = arith.constant 0 : i32
    return %c0_i32, %c0_i32_0 : i32, i32
  }
  func.func @transform_9(%arg0: i32) -> (i32, i32) {
    %c0_i32 = arith.constant 0 : i32
    %c0_i32_0 = arith.constant 0 : i32
    return %c0_i32, %arg0 : i32, i32
  }
}

</mosaic_0001>

<bundles_post_ra>
// kernel: light_fuse_sft.1
= control target key start
LH: loop header
LB: loop body
LE: loop exit
PB: predicated region body
PF: predicated region fallthrough
CT: control target
= control target key end

     0   :  { %vm79_vm0 = vcmask 64512   ;;  %v1006_v3 = vmov 0   ;;  %s1010_s21 = smov 1   ;;  %s1011_s22 = smov 127   ;;  %v35_v28 = vlaneseq  ;;  %s1742_s1 = inlined_call_operand.vmem [shape: f32[8,512], index: 1, kind: input, shape index: {}]   ;;  %s1743_s3 = inlined_call_operand.vmem [shape: f32[8,8], index: 3, kind: input, shape index: {}]   ;;  %s1744_s4 = inlined_call_operand.vmem [shape: f32[8,1], index: 4, kind: input, shape index: {}]   ;;  %s1745_s6 = inlined_call_operand.vmem [shape: f32[8,1], index: 6, kind: input, shape index: {}]   ;;  %s1746_s5 = inlined_call_operand.vmem [shape: f32[8,72], index: 5, kind: input, shape index: {}]   ;;  %s1747_s8 = inlined_call_operand.vmem [shape: f32[16,1], index: 8, kind: input, shape index: {}]   ;;  %s1748_s7 = inlined_call_operand.vmem [shape: f32[16,72], index: 7, kind: input, shape index: {}]   ;;  %s1749_s2 = inlined_call_operand.vmem [shape: f32[4,512], index: 2, kind: input, shape index: {}]   ;;  %s1750_s0 = inlined_call_operand.<no memory space> [shape: f32[1,1], index: 0, kind: input, shape index: {}]   ;;  %s1751_s9 = inlined_call_operand.vmem [shape: f32[4,512], index: 9, kind: output, shape index: {}]  }
   0x1   :  { %v68_v0 = vld [vmem:[%s1742_s1] sm:$0xff]  ;;  %v69_v1 = vld [vmem:[%s1742_s1 + $0x8] sm:$0xff]  ;;  %v70_v2 = vld [vmem:[%s1742_s1 + $0x10] sm:$0xff]  ;;  %1004 = vset.pattern.permute.xlu0 %v1006_v3  ;;  %1005 = vset.pattern.permute.xlu1 %v1006_v3  ;;  %s1012_s23 = smov 17   ;;  %s1013_s24 = smov 15  }
   0x2   :  { %98 = vmatpush.msra.mxu0 %v68_v0  ;;  %118 = vmatpush.msra.mxu1 %v69_v1  ;;  %v71_v4 = vld [vmem:[%s1742_s1 + $0x18] sm:$0xff]  ;;  %v72_v5 = vld [vmem:[%s1743_s3] sm:$0xff]  ;;  %s1007_s1 = smov 112   ;;  %s1008_s3 = smov 111   ;;  %v1164_v29 = vand.u32 127, %v35_v28 }
   0x3   :  { %138 = vmatpush.msra.mxu2 %v70_v2  ;;  %158 = vmatpush.msra.mxu3 %v71_v4  ;;  %v73_v6 = vld [vmem:[%s1744_s4] sm:$0xff]  ;;  %s1009_s4 = smov 113   ;;  %s1014_s25 = smov 16  }
   0x4   :  { %915 = vmatmul.msk.f32.vlgmr.msra.gmra.mxu0 %vm79_vm0, %v72_v5  ;;  %916 = vmatmul.msk.f32.vlgmr.msra.gmra.mxu1 %vm79_vm0, %v72_v5  ;;  %v175_v24 = vld [vmem:[%s1745_s6] sm:$0xff]  ;;  %v38_v30 = vadd.s32 256, %v1164_v29  ;;  %v39_v33 = vadd.s32 384, %v1164_v29  ;;  %v37_v44 = vadd.s32 128, %v1164_v29  ;;  %v40_v45 = vand.u32 255, %v1164_v29 }
   0x5   :  { %917 = vmatmul.msk.f32.vlgmr.msra.gmra.mxu2 %vm79_vm0, %v72_v5  ;;  %918 = vmatmul.msk.f32.vlgmr.msra.gmra.mxu3 %vm79_vm0, %v72_v5  ;;  %vm1755_vm9 = vcmp.lt.s32.totalorder %v1164_v29, 111  ;;  %vm1757_vm12 = vcmp.lt.s32.totalorder %v1164_v29, 112 }
   0x6   :  { %76 = vperm.xlu0 %1004, %v73_v6   ;;  %v42_v35 = vand.u32 255, %v38_v30  ;;  %v43_v36 = vand.u32 255, %v39_v33  ;;  %v41_v46 = vand.u32 255, %v37_v44  ;;  %v1203_v49 = vshra.s32 %v40_v45, 4 }
   0x7   :  { %v1205_v50 = vand.u32 15, %v40_v45  ;;  %v733_v45 = vld [vmem:[%s1748_s7 + $0x8] sm:$0xff] }
   0x8   :  { %v1170_v37 = vshra.s32 %v42_v35, 4  ;;  %v1172_v38 = vand.u32 15, %v42_v35  ;;  %v1176_v41 = vshra.s32 %v43_v36, 4  ;;  %v1178_v42 = vand.u32 15, %v43_v36 }
   0x9   :  { %v1211_v56 = vshra.s32 %v41_v46, 4  ;;  %v1213_v57 = vand.u32 15, %v41_v46  ;;  %vm1759_vm13 = vcmp.le.s32.totalorder %v1203_v49, 14  ;;  %vm1765_vm14 = vcmp.le.s32.totalorder %v1205_v50, 14 }
   0xa   :  { %vm1761_vm5 = vcmp.le.s32.totalorder %v1170_v37, 14  ;;  %vm1752_vm6 = vcmp.le.s32.totalorder %v1172_v38, 14  ;;  %vm1753_vm7 = vcmp.le.s32.totalorder %v1176_v41, 14  ;;  %vm1766_vm8 = vcmp.le.s32.totalorder %v1178_v42, 14 }
   0xb   :  { %vm1191_vm10 = vmand %vm1761_vm5, %vm1752_vm6  ;;  %vm1754_vm15 = vcmp.ge.s32.totalorder %v1178_v42, 1  ;;  %vm1760_vm0 = vcmp.le.s32.totalorder %v1211_v56, 14  ;;  %vm1762_vm6 = vcmp.lt.s32.totalorder %v1164_v29, 113  ;;  %v1808_v35 = vmov 0 }
   0xc   :  { %vm1199_vm11 = vmand %vm1753_vm7, %vm1766_vm8 }
  0x78   :  { %v77_v7 = vpop.permute.xlu0 %76 }
  0x81   :  { %v100_v8 = vpop.f32.mrf.mxu0  ;;  %v120_v9 = vpop.f32.mrf.mxu1 }
  0x82   :  { %v101_v10 = vadd.f32 %v100_v8, %v77_v7  ;;  %v121_v11 = vadd.f32 %v120_v9, %v77_v7  ;;  %v1796_v9 = vmov 0 }
  0x84   :  { %vm163_vm1 = vcmp.gt.f32.partialorder %v101_v10, 0.0  ;;  %v167_v12 = vmul.f32 0.2, %v101_v10  ;;  %vm164_vm2 = vcmp.gt.f32.partialorder %v121_v11, 0.0  ;;  %v168_v13 = vmul.f32 0.2, %v121_v11 }
  0x86   :  { %v1083_v14 = vsel %vm163_vm1, %v101_v10, %v167_v12  ;;  %v1085_v15 = vsel %vm164_vm2, %v121_v11, %v168_v13  ;;  %vm1756_vm1 = vcmp.le.s32.totalorder %v1213_v57, 14  ;;  %vm1233_vm2 = vmand %vm1759_vm13, %vm1765_vm14  ;;  %v1798_v10 = vmov 0 }
  0x87   :  { %368 = vrot.lane.b32.xlu2 %v1085_v15, %s1007_s1  ;;  %366 = vrot.lane.b32.xlu1 %v1083_v14, %s1007_s1 }
  0x88   :  { %395 = vrot.lane.b32.xlu0 %v1083_v14, %s1008_s3  ;;  %v160_v16 = vpop.f32.mrf.mxu3  ;;  %v140_v20 = vpop.f32.mrf.mxu2 }
  0x89   :  { %v161_v17 = vadd.f32 %v160_v16, %v77_v7  ;;  %v141_v21 = vadd.f32 %v140_v20, %v77_v7 }
  0x8b   :  { %v170_v18 = vmul.f32 0.2, %v161_v17  ;;  %vm166_vm3 = vcmp.gt.f32.partialorder %v161_v17, 0.0  ;;  %v169_v22 = vmul.f32 0.2, %v141_v21  ;;  %vm165_vm4 = vcmp.gt.f32.partialorder %v141_v21, 0.0 }
  0x8d   :  { %v1099_v19 = vsel %vm166_vm3, %v161_v17, %v170_v18  ;;  %v1119_v23 = vsel %vm165_vm4, %v141_v21, %v169_v22  ;;  %vm1241_vm3 = vmand %vm1753_vm7, %vm1754_vm15  ;;  %vm1764_vm15 = vcmp.ge.s32.totalorder %v1213_v57, 1 }
  0x8e   :  { %vm1249_vm4 = vmand %vm1760_vm0, %vm1756_vm1  ;;  %vm1768_vm1 = vcmp.ge.s32.totalorder %v1172_v38, 1 }
  0x8f   :  { %335 = vrot.lane.b32.xlu2 %v1085_v15, %s1009_s4  ;;  %271 = vrot.lane.b32.xlu1 %v1083_v14, %s1010_s21 }
  0x90   :  { %333 = vrot.lane.b32.xlu0 %v1083_v14, %s1009_s4 }
  0x97   :  { %273 = vrot.lane.b32.xlu2 %v1085_v15, %s1010_s21  ;;  %401 = vrot.lane.b32.xlu1 %v1099_v19, %s1008_s3 }
  0x98   :  { %304 = vrot.lane.b32.xlu0 %v1083_v14, %s1011_s22 }
  0x9f   :  { %178 = vrot.lane.b32.xlu2 %v1085_v15, %s1012_s23  ;;  %339 = vrot.lane.b32.xlu1 %v1099_v19, %s1009_s4 }
  0xa0   :  { %397 = vrot.lane.b32.xlu0 %v1085_v15, %s1008_s3 }
  0xa7   :  { %372 = vrot.lane.b32.xlu2 %v1099_v19, %s1007_s1  ;;  %310 = vrot.lane.b32.xlu1 %v1099_v19, %s1011_s22 }
  0xa8   :  { %306 = vrot.lane.b32.xlu0 %v1085_v15, %s1011_s22 }
  0xaf   :  { %399 = vrot.lane.b32.xlu2 %v1119_v23, %s1008_s3  ;;  %308 = vrot.lane.b32.xlu1 %v1119_v23, %s1011_s22 }
  0xb0   :  { %240 = vrot.lane.b32.xlu0 %v1085_v15, %s1013_s24 }
  0xb7   :  { %370 = vrot.lane.b32.xlu2 %v1119_v23, %s1007_s1  ;;  %277 = vrot.lane.b32.xlu1 %v1099_v19, %s1010_s21 }
  0xb8   :  { %211 = vrot.lane.b32.xlu0 %v1085_v15, %s1014_s25 }
  0xbf   :  { %337 = vrot.lane.b32.xlu2 %v1119_v23, %s1009_s4  ;;  %244 = vrot.lane.b32.xlu1 %v1099_v19, %s1013_s24 }
  0xc0   :  { %275 = vrot.lane.b32.xlu0 %v1119_v23, %s1010_s21 }
  0xc7   :  { %215 = vrot.lane.b32.xlu2 %v1099_v19, %s1014_s25  ;;  %213 = vrot.lane.b32.xlu1 %v1119_v23, %s1014_s25 }
  0xc8   :  { %242 = vrot.lane.b32.xlu0 %v1119_v23, %s1013_s24 }
  0xcf   :  { %182 = vrot.lane.b32.xlu2 %v1099_v19, %s1012_s23  ;;  %180 = vrot.lane.b32.xlu1 %v1119_v23, %s1012_s23 }
  0xd0   :  { %238 = vrot.lane.b32.xlu0 %v1083_v14, %s1013_s24 }
  0xd7   :  { %176 = vrot.lane.b32.xlu2 %v1083_v14, %s1012_s23  ;;  %209 = vrot.lane.b32.xlu1 %v1083_v14, %s1014_s25 }
  0xd8   :  { %467 = vperm.xlu0 %1004, %v175_v24  }
  0xe1   :  { %v1158_v25 = vpop.permute.xlu2 %368 }
  0xe9   :  { %v1160_v26 = vpop.permute.xlu2 %335 }
  0xf1   :  { %v1162_v27 = vpop.permute.xlu2 %273 }
  0xf9   :  { %v1167_v31 = vpop.permute.xlu2 %178  ;;  %v367_v32 = vpop.permute.xlu1 %366 }
  0xfa   :  { %v396_v34 = vpop.permute.xlu0 %395  ;;  %v377_v5 = vsel %vm1757_vm12, %v367_v32, %v1158_v25 }
 0x101   :  { %v373_v39 = vpop.permute.xlu2 %372  ;;  %v1174_v40 = vpop.permute.xlu1 %271 }
 0x102   :  { %v334_v43 = vpop.permute.xlu0 %333  ;;  %v378_v58 = vsel %vm1757_vm12, %v373_v39, %v367_v32 }
 0x103   :  { %v344_v8 = vsel %vm1762_vm6, %v334_v43, %v1160_v26 }
 0x109   :  { %v400_v51 = vpop.permute.xlu2 %399  ;;  %v402_v52 = vpop.permute.xlu1 %401 }
 0x10a   :  { %v305_v53 = vpop.permute.xlu0 %304  ;;  %v404_v54 = vsel %vm1755_vm9, %v400_v51, %v402_v52  ;;  %v407_v55 = vsel %vm1755_vm9, %v402_v52, %v396_v34  ;;  %v1818_v52 = vmov 0 }
 0x10b   :  { %947 = vmatpush.msk.msrb.mxu2 %vm1191_vm10, %v404_v54  ;;  %955 = vmatpush.msk.msrb.mxu3 %vm1199_vm11, %v407_v55  ;;  %v1821_v54 = vmov 0 }
 0x10d   :  { %956 = vmatpush.msk.msrb.mxu3 %vm1753_vm7, %v378_v58  ;;  %vm1758_vm7 = vcmp.ge.s32.totalorder %v1205_v50, 1 }
 0x111   :  { %v371_v61 = vpop.permute.xlu2 %370  ;;  %v340_v62 = vpop.permute.xlu1 %339 }
 0x112   :  { %v398_v0 = vpop.permute.xlu0 %397  ;;  %v375_v1 = vsel %vm1757_vm12, %v371_v61, %v373_v39  ;;  %v345_v2 = vsel %vm1762_vm6, %v340_v62, %v334_v43  ;;  %v376_v6 = vsel %vm1757_vm12, %v1158_v25, %v371_v61  ;;  %vm1763_vm12 = vcmp.lt.s32.totalorder %v1164_v29, 127 }
 0x113   :  { %v406_v3 = vsel %vm1755_vm9, %v396_v34, %v398_v0  ;;  %v405_v4 = vsel %vm1755_vm9, %v398_v0, %v400_v51  ;;  %948 = vmatpush.msk.msrb.mxu2 %vm1761_vm5, %v375_v1  ;;  %957 = vmatpush.msk.msrb.mxu3 %vm1241_vm3, %v345_v2  ;;  %vm1282_vm9 = vmand %vm1759_vm13, %vm1758_vm7  ;;  %v1814_v51 = vmov 0 }
 0x114   :  { %931 = vmatpush.msk.msrb.mxu0 %vm1233_vm2, %v406_v3  ;;  %939 = vmatpush.msk.msrb.mxu1 %vm1249_vm4, %v405_v4  ;;  %vm1299_vm7 = vmand %vm1760_vm0, %vm1764_vm15 }
 0x115   :  { %v1797_v9 = vsel %vm1299_vm7, 4294967295, %v1796_v9 }
 0x116   :  { %932 = vmatpush.msk.msrb.mxu0 %vm1759_vm13, %v377_v5  ;;  %940 = vmatpush.msk.msrb.mxu1 %vm1760_vm0, %v376_v6  ;;  %vm1309_vm13 = vmand %vm1761_vm5, %vm1768_vm1  ;;  %vm1800_vm0 = vcmp.le.s32.totalorder %v1213_v57, 14  ;;  %vm1801_vm5 = vcmp.le.s32.totalorder %v1172_v38, 14 }
 0x117   :  { %v1799_v10 = vsel %vm1309_vm13, 4294967295, %v1798_v10 }
 0x118   :  { %933 = vmatpush.msk.msrb.mxu0 %vm1282_vm9, %v344_v8 }
 0x119   :  { %v338_v11 = vpop.permute.xlu2 %337  ;;  %v311_v12 = vpop.permute.xlu1 %310 }
 0x11a   :  { %v307_v13 = vpop.permute.xlu0 %306  ;;  %v343_v16 = vsel %vm1762_vm6, %v1160_v26, %v338_v11  ;;  %v342_v17 = vsel %vm1762_vm6, %v338_v11, %v340_v62  ;;  %v316_v18 = vsel %vm1763_vm12, %v311_v12, %v305_v53  ;;  %vm1767_vm6 = vcmp.lt.s32.totalorder %v1164_v29, 1  ;;  %v428_v62 = vld [vmem:[%s1746_s5] sm:$0xff] }
 0x11b   :  { %v315_v20 = vsel %vm1763_vm12, %v305_v53, %v307_v13  ;;  %941 = vmatpush.msk.msrb.mxu1 %vm1299_vm7, %v343_v16  ;;  %949 = vmatpush.msk.msrb.mxu2 %vm1309_vm13, %v342_v17  ;;  %vm1817_vm13 = vcmp.ge.s32.totalorder %v1176_v41, 1 }
 0x11c   :  { %934 = vmatpush.msk.msrb.mxu0 %vm1765_vm14, %v315_v20  ;;  %958 = vmatpush.msk.msrb.mxu3 %vm1766_vm8, %v316_v18  ;;  %vm1804_vm14 = vcmp.le.s32.totalorder %v1172_v38, 14 }
 0x11e   :  { %485 = vmatpush.msrb.mxu0 %v1083_v14  ;;  %545 = vmatpush.msrb.mxu3 %v1099_v19  ;;  %v282_v14 = vsel %vm1767_vm6, %v1174_v40, %v1162_v27 }
 0x121   :  { %v309_v21 = vpop.permute.xlu1 %308  ;;  %v216_v33 = vpop.permute.xlu2 %215 }
 0x122   :  { %v241_v22 = vpop.permute.xlu0 %240  ;;  %v314_v24 = vsel %vm1763_vm12, %v307_v13, %v309_v21  ;;  %v313_v25 = vsel %vm1763_vm12, %v309_v21, %v311_v12  ;;  %vm1777_vm12 = vcmp.ge.s32.totalorder %v1170_v37, 1 }
 0x123   :  { %942 = vmatpush.msk.msrb.mxu1 %vm1800_vm0, %v314_v24  ;;  %950 = vmatpush.msk.msrb.mxu2 %vm1801_vm5, %v313_v25  ;;  %vm1802_vm5 = vcmp.ge.s32.totalorder %v1205_v50, 1  ;;  %vm1803_vm0 = vcmp.ge.s32.totalorder %v1178_v42, 1  ;;  %vm1370_vm8 = vmand %vm1777_vm12, %vm1804_vm14  ;;  %vm1776_vm14 = vcmp.ge.s32.totalorder %v1203_v49, 1 }
 0x125   :  { %505 = vmatpush.msrb.mxu1 %v1085_v15  ;;  %525 = vmatpush.msrb.mxu2 %v1119_v23 }
 0x127   :  { %943 = vmatpush.msk.msrb.mxu1 %vm1764_vm15, %v282_v14  ;;  %vm1769_vm15 = vcmp.lt.s32.totalorder %v1164_v29, 15 }
 0x129   :  { %v278_v19 = vpop.permute.xlu1 %277  ;;  %v183_v46 = vpop.permute.xlu2 %182 }
 0x12a   :  { %v212_v26 = vpop.permute.xlu0 %211  ;;  %v283_v28 = vsel %vm1767_vm6, %v278_v19, %v1174_v40 }
 0x12b   :  { %935 = vmatpush.msk.msrb.mxu0 %vm1802_vm5, %v283_v28  ;;  %vm1773_vm5 = vcmp.ge.s32.totalorder %v1176_v41, 1 }
 0x131   :  { %v245_v15 = vpop.permute.xlu1 %244  ;;  %v177_v2 = vpop.permute.xlu2 %176 }
 0x132   :  { %v276_v30 = vpop.permute.xlu0 %275 }
 0x133   :  { %v281_v23 = vsel %vm1767_vm6, %v1162_v27, %v276_v30  ;;  %v280_v32 = vsel %vm1767_vm6, %v276_v30, %v278_v19  ;;  %v1805_v27 = vmov 0  ;;  %vm1807_vm6 = vcmp.le.s32.totalorder %v1178_v42, 14 }
 0x134   :  { %951 = vmatpush.msk.msrb.mxu2 %vm1768_vm1, %v281_v23  ;;  %959 = vmatpush.msk.msrb.mxu3 %vm1803_vm0, %v280_v32  ;;  %v1806_v27 = vsel %vm1370_vm8, 4294967295, %v1805_v27  ;;  %vm1378_vm0 = vmand %vm1773_vm5, %vm1807_vm6  ;;  %vm1772_vm1 = vcmp.lt.s32.totalorder %v1164_v29, 16  ;;  %vm1810_vm6 = vcmp.le.s32.totalorder %v1205_v50, 14  ;;  %v566_v32 = vld [vmem:[%s1747_s8] sm:$0xff] }
 0x135   :  { %v1809_v35 = vsel %vm1378_vm0, 4294967295, %v1808_v35 }
 0x139   :  { %v214_v34 = vpop.permute.xlu1 %213 }
 0x13a   :  { %v243_v36 = vpop.permute.xlu0 %242  ;;  %v219_v43 = vsel %vm1772_vm1, %v212_v26, %v214_v34  ;;  %v218_v44 = vsel %vm1772_vm1, %v214_v34, %v216_v33 }
 0x13b   :  { %v248_v39 = vsel %vm1769_vm15, %v241_v22, %v243_v36  ;;  %v247_v40 = vsel %vm1769_vm15, %v243_v36, %v245_v15  ;;  %vm1404_vm15 = vmand %vm1776_vm14, %vm1810_vm6  ;;  %vm1820_vm6 = vcmp.le.s32.totalorder %v1213_v57, 14 }
 0x13c   :  { %952 = vmatpush.msk.msrb.mxu2 %vm1370_vm8, %v248_v39  ;;  %960 = vmatpush.msk.msrb.mxu3 %vm1378_vm0, %v247_v40  ;;  %vm1779_vm0 = vcmp.ge.s32.totalorder %v1211_v56, 1  ;;  %vm1813_vm8 = vcmp.ge.s32.totalorder %v1172_v38, 1 }
 0x13d   :  { %vm1413_vm1 = vmand %vm1777_vm12, %vm1813_vm8  ;;  %vm1778_vm8 = vcmp.lt.s32.totalorder %v1164_v29, 17 }
 0x13e   :  { %953 = vmatpush.msk.msrb.mxu2 %vm1777_vm12, %v219_v43  ;;  %961 = vmatpush.msk.msrb.mxu3 %vm1773_vm5, %v218_v44  ;;  %v1815_v51 = vsel %vm1413_vm1, 4294967295, %v1814_v51  ;;  %vm1816_vm5 = vcmp.ge.s32.totalorder %v1178_v42, 1  ;;  %vm1429_vm14 = vmand %vm1779_vm0, %vm1820_vm6 }
 0x13f   :  { %vm1421_vm7 = vmand %vm1817_vm13, %vm1816_vm5  ;;  %v1822_v54 = vsel %vm1429_vm14, 4294967295, %v1821_v54  ;;  %vm1781_vm13 = vcmask 588800   ;;  %vm1823_vm5 = vcmp.lt.s32.totalorder %v1164_v29, 15 }
 0x140   :  { %v1819_v52 = vsel %vm1421_vm7, 4294967295, %v1818_v52  ;;  %vm1824_vm6 = vmmov %vm1823_vm5 }
 0x141   :  { %v181_v53 = vpop.permute.xlu1 %180 }
 0x142   :  { %v239_v55 = vpop.permute.xlu0 %238  ;;  %v186_v58 = vsel %vm1778_vm8, %v1167_v31, %v181_v53  ;;  %v185_v61 = vsel %vm1778_vm8, %v181_v53, %v183_v46  ;;  %vm1829_vm8 = vcmp.lt.s32.totalorder %v1164_v29, 16 }
 0x143   :  { %v250_v0 = vsel %vm1823_vm5, %v245_v15, %v239_v55  ;;  %v249_v1 = vsel %vm1824_vm6, %v239_v55, %v241_v22  ;;  %954 = vmatpush.msk.msrb.mxu2 %vm1413_vm1, %v186_v58  ;;  %962 = vmatpush.msk.msrb.mxu3 %vm1421_vm7, %v185_v61  ;;  %vm1825_vm5 = vcmp.ge.s32.totalorder %v1205_v50, 1  ;;  %vm1826_vm6 = vcmp.ge.s32.totalorder %v1203_v49, 1  ;;  %vm1830_vm0 = vmmov %vm1829_vm8 }
 0x144   :  { %936 = vmatpush.msk.msrb.mxu0 %vm1404_vm15, %v250_v0  ;;  %944 = vmatpush.msk.msrb.mxu1 %vm1429_vm14, %v249_v1  ;;  %vm1460_vm12 = vmand %vm1826_vm6, %vm1825_vm5  ;;  %vm1831_vm7 = vcmp.ge.s32.totalorder %v1213_v57, 1 }
 0x145   :  { %921 = vmatmul.msk.f32.vlgmr.msrb.gmra.mxu2 %vm1781_vm13, %v428_v62  ;;  %922 = vmatmul.msk.f32.vlgmr.msrb.gmra.mxu3 %vm1781_vm13, %v428_v62  ;;  %vm1832_vm13 = vcmp.ge.s32.totalorder %v1211_v56, 1  ;;  %vm1835_vm14 = vmmov %vm1826_vm6  ;;  %vm1837_vm6 = vcmp.lt.s32.totalorder %v1164_v29, 17 }
 0x146   :  { %vm1472_vm1 = vmand %vm1832_vm13, %vm1831_vm7  ;;  %v188_v11 = vsel %vm1837_vm6, %v183_v46, %v177_v2  ;;  %vm1839_vm7 = vcmask 588800  }
 0x147   :  { %vm1836_vm5 = vmmov %vm1832_vm13 }
 0x149   :  { %v210_v3 = vpop.permute.xlu1 %209 }
 0x14a   :  { %v221_v5 = vsel %vm1829_vm8, %v216_v33, %v210_v3  ;;  %v220_v6 = vsel %vm1830_vm0, %v210_v3, %v212_v26  ;;  %vm1838_vm0 = vmmov %vm1837_vm6  ;;  %v468_v13 = vpop.permute.xlu0 %467 }
 0x14b   :  { %937 = vmatpush.msk.msrb.mxu0 %vm1835_vm14, %v221_v5  ;;  %945 = vmatpush.msk.msrb.mxu1 %vm1836_vm5, %v220_v6  ;;  %v187_v12 = vsel %vm1838_vm0, %v177_v2, %v1167_v31  ;;  %vm1840_vm8 = vmmov %vm1839_vm7  ;;  %vm1841_vm0 = vcmp.lt.s32.totalorder %v1164_v29, 111 }
 0x14d   :  { %938 = vmatpush.msk.msrb.mxu0 %vm1460_vm12, %v188_v11  ;;  %946 = vmatpush.msk.msrb.mxu1 %vm1472_vm1, %v187_v12 }
 0x14e   :  { %919 = vmatmul.msk.f32.vlgmr.msrb.gmra.mxu0 %vm1839_vm7, %v428_v62  ;;  %920 = vmatmul.msk.f32.vlgmr.msrb.gmra.mxu1 %vm1840_vm8, %v428_v62  ;;  %vm1842_vm7 = vmmov %vm1841_vm0  ;;  %vm1843_vm8 = vcmp.lt.s32.totalorder %v1164_v29, 112 }
 0x1c8   :  { %v551_v25 = vpop.f32.mrf.mxu3  ;;  %v531_v28 = vpop.f32.mrf.mxu2 }
 0x1c9   :  { %v552_v14 = vadd.f32 %v551_v25, %v468_v13  ;;  %v532_v15 = vadd.f32 %v531_v28, %v468_v13 }
 0x1cb   :  { %v491_v16 = vpop.f32.mrf.mxu0  ;;  %v511_v17 = vpop.f32.mrf.mxu1  ;;  %v561_v19 = vmul.f32 0.2, %v552_v14  ;;  %vm557_vm5 = vcmp.gt.f32.partialorder %v552_v14, 0.0  ;;  %v560_v30 = vmul.f32 0.2, %v532_v15  ;;  %vm556_vm6 = vcmp.gt.f32.partialorder %v532_v15, 0.0 }
 0x1cc   :  { %v492_v18 = vadd.f32 %v491_v16, %v468_v13  ;;  %v512_v20 = vadd.f32 %v511_v17, %v468_v13 }
 0x1cd   :  { %v1507_v26 = vsel %vm557_vm5, %v552_v14, %v561_v19  ;;  %v1527_v23 = vsel %vm556_vm6, %v532_v15, %v560_v30  ;;  %vm1847_vm5 = vmmov %vm1841_vm0  ;;  %vm1848_vm6 = vcmp.lt.s32.totalorder %v1164_v29, 113 }
 0x1ce   :  { %vm554_vm14 = vcmp.gt.f32.partialorder %v492_v18, 0.0  ;;  %v558_v21 = vmul.f32 0.2, %v492_v18  ;;  %vm555_vm13 = vcmp.gt.f32.partialorder %v512_v20, 0.0  ;;  %v559_v22 = vmul.f32 0.2, %v512_v20 }
 0x1d0   :  { %v1491_v31 = vsel %vm554_vm14, %v492_v18, %v558_v21  ;;  %v1493_v24 = vsel %vm555_vm13, %v512_v20, %v559_v22  ;;  %vm1844_vm14 = vcmp.le.s32.totalorder %v1176_v41, 14  ;;  %vm1845_vm13 = vmmov %vm1843_vm8 }
 0x1d1   :  { %694 = vrot.lane.b32.xlu2 %v1493_v24, %s1007_s1  ;;  %692 = vrot.lane.b32.xlu0 %v1491_v31, %s1007_s1 }
 0x1d2   :  { %712 = vrot.lane.b32.xlu1 %v1491_v31, %s1008_s3 }
 0x1d9   :  { %674 = vrot.lane.b32.xlu2 %v1493_v24, %s1009_s4  ;;  %672 = vrot.lane.b32.xlu0 %v1491_v31, %s1009_s4 }
 0x1da   :  { %628 = vrot.lane.b32.xlu1 %v1491_v31, %s1010_s21 }
 0x1e1   :  { %630 = vrot.lane.b32.xlu2 %v1493_v24, %s1010_s21  ;;  %652 = vrot.lane.b32.xlu0 %v1491_v31, %s1011_s22 }
 0x1e2   :  { %698 = vrot.lane.b32.xlu1 %v1507_v26, %s1007_s1 }
 0x1e9   :  { %570 = vrot.lane.b32.xlu2 %v1493_v24, %s1012_s23  ;;  %714 = vrot.lane.b32.xlu0 %v1493_v24, %s1008_s3 }
 0x1ea   :  { %678 = vrot.lane.b32.xlu1 %v1507_v26, %s1009_s4 }
 0x1f1   :  { %718 = vrot.lane.b32.xlu2 %v1507_v26, %s1008_s3  ;;  %654 = vrot.lane.b32.xlu0 %v1493_v24, %s1011_s22 }
 0x1f2   :  { %658 = vrot.lane.b32.xlu1 %v1507_v26, %s1011_s22 }
 0x1f9   :  { %716 = vrot.lane.b32.xlu2 %v1527_v23, %s1008_s3  ;;  %610 = vrot.lane.b32.xlu0 %v1493_v24, %s1013_s24 }
 0x1fa   :  { %656 = vrot.lane.b32.xlu1 %v1527_v23, %s1011_s22 }
 0x201   :  { %696 = vrot.lane.b32.xlu2 %v1527_v23, %s1007_s1  ;;  %590 = vrot.lane.b32.xlu0 %v1493_v24, %s1014_s25 }
 0x202   :  { %634 = vrot.lane.b32.xlu1 %v1507_v26, %s1010_s21 }
 0x209   :  { %676 = vrot.lane.b32.xlu2 %v1527_v23, %s1009_s4  ;;  %632 = vrot.lane.b32.xlu0 %v1527_v23, %s1010_s21 }
 0x20a   :  { %614 = vrot.lane.b32.xlu1 %v1507_v26, %s1013_s24 }
 0x211   :  { %594 = vrot.lane.b32.xlu2 %v1507_v26, %s1014_s25  ;;  %612 = vrot.lane.b32.xlu0 %v1527_v23, %s1013_s24 }
 0x212   :  { %592 = vrot.lane.b32.xlu1 %v1527_v23, %s1014_s25 }
 0x219   :  { %574 = vrot.lane.b32.xlu2 %v1507_v26, %s1012_s23  ;;  %608 = vrot.lane.b32.xlu0 %v1491_v31, %s1013_s24 }
 0x21a   :  { %572 = vrot.lane.b32.xlu1 %v1527_v23, %s1012_s23 }
 0x221   :  { %568 = vrot.lane.b32.xlu2 %v1491_v31, %s1012_s23  ;;  %772 = vperm.xlu0 %1004, %v566_v32  }
 0x222   :  { %588 = vrot.lane.b32.xlu1 %v1491_v31, %s1014_s25 }
 0x22b   :  { %v695_v33 = vpop.permute.xlu2 %694 }
 0x233   :  { %v675_v34 = vpop.permute.xlu2 %674 }
 0x23b   :  { %v1566_v36 = vpop.permute.xlu2 %630 }
 0x243   :  { %v1568_v39 = vpop.permute.xlu2 %570  ;;  %v693_v40 = vpop.permute.xlu0 %692 }
 0x244   :  { %v713_v43 = vpop.permute.xlu1 %712 }
 0x24b   :  { %v719_v44 = vpop.permute.xlu2 %718  ;;  %v673_v46 = vpop.permute.xlu0 %672 }
 0x24c   :  { %v723_v53 = vsel %vm1841_vm0, %v719_v44, %v713_v43  ;;  %v629_v55 = vpop.permute.xlu1 %628 }
 0x24d   :  { %987 = vmatpush.msk.msra.mxu3 %vm1199_vm11, %v723_v53  ;;  %vm1846_vm11 = vmmov %vm1841_vm0 }
 0x24e   :  { %vm1850_vm0 = vmmov %vm1843_vm8 }
 0x253   :  { %v717_v58 = vpop.permute.xlu2 %716  ;;  %v653_v61 = vpop.permute.xlu0 %652 }
 0x254   :  { %v720_v62 = vsel %vm1842_vm7, %v717_v58, %v719_v44  ;;  %v699_v0 = vpop.permute.xlu1 %698  ;;  %vm1851_vm7 = vcmp.le.s32.totalorder %v1170_v37, 14 }
 0x255   :  { %v703_v1 = vsel %vm1843_vm8, %v699_v0, %v693_v40  ;;  %979 = vmatpush.msk.msra.mxu2 %vm1191_vm10, %v720_v62  ;;  %vm1849_vm10 = vmmov %vm1843_vm8  ;;  %vm1852_vm8 = vcmp.le.s32.totalorder %v1203_v49, 14 }
 0x256   :  { %988 = vmatpush.msk.msra.mxu3 %vm1844_vm14, %v703_v1  ;;  %v702_v47 = vsel %vm1849_vm10, %v693_v40, %v695_v33  ;;  %vm1862_vm10 = vcmp.le.s32.totalorder %v1178_v42, 14 }
 0x25b   :  { %v697_v2 = vpop.permute.xlu2 %696  ;;  %v715_v3 = vpop.permute.xlu0 %714 }
 0x25c   :  { %v700_v48 = vsel %vm1845_vm13, %v697_v2, %v699_v0  ;;  %v721_v5 = vsel %vm1846_vm11, %v715_v3, %v717_v58  ;;  %v722_v6 = vsel %vm1847_vm5, %v713_v43, %v715_v3  ;;  %v679_v11 = vpop.permute.xlu1 %678  ;;  %v701_v13 = vsel %vm1850_vm0, %v695_v33, %v697_v2  ;;  %v732_v43 = vld [vmem:[%s1748_s7] sm:$0xff]  ;;  %v34_v2 = vld [vmem:[%s1749_s2 + $0x8] sm:$0xff] }
 0x25d   :  { %v683_v12 = vsel %vm1848_vm6, %v679_v11, %v673_v46  ;;  %963 = vmatpush.msk.msra.mxu0 %vm1233_vm2, %v722_v6  ;;  %971 = vmatpush.msk.msra.mxu1 %vm1249_vm4, %v721_v5  ;;  %vm1853_vm2 = vcmp.le.s32.totalorder %v1211_v56, 14  ;;  %vm1854_vm4 = vmmov %vm1848_vm6  ;;  %vm1859_vm5 = vcmp.le.s32.totalorder %v1205_v50, 14  ;;  %vm1861_vm6 = vnez %v1799_v10 }
 0x25e   :  { %980 = vmatpush.msk.msra.mxu2 %vm1851_vm7, %v700_v48  ;;  %989 = vmatpush.msk.msra.mxu3 %vm1241_vm3, %v683_v12  ;;  %v682_v59 = vsel %vm1854_vm4, %v673_v46, %v675_v34  ;;  %vm1855_vm14 = vmmov %vm1854_vm4  ;;  %vm1857_vm3 = vcmp.lt.s32.totalorder %v1164_v29, 127 }
 0x25f   :  { %964 = vmatpush.msk.msra.mxu0 %vm1852_vm8, %v702_v47  ;;  %972 = vmatpush.msk.msra.mxu1 %vm1853_vm2, %v701_v13  ;;  %vm1856_vm13 = vmmov %vm1854_vm4  ;;  %vm1865_vm8 = vcmp.le.s32.totalorder %v1213_v57, 14  ;;  %vm1866_vm2 = vcmp.le.s32.totalorder %v1172_v38, 14  ;;  %vm1867_vm4 = vcmp.lt.s32.totalorder %v1164_v29, 1 }
 0x260   :  { %vm1858_vm11 = vmmov %vm1857_vm3 }
 0x261   :  { %965 = vmatpush.msk.msra.mxu0 %vm1282_vm9, %v682_v59  ;;  %vm1860_vm9 = vnez %v1797_v9  ;;  %vm1863_vm0 = vmmov %vm1857_vm3  ;;  %v638_v9 = vsel %vm1867_vm4, %v629_v55, %v1566_v36 }
 0x262   :  { %vm1864_vm7 = vmmov %vm1863_vm0 }
 0x263   :  { %v677_v63 = vpop.permute.xlu2 %676  ;;  %v655_v16 = vpop.permute.xlu0 %654 }
 0x264   :  { %v680_v17 = vsel %vm1855_vm14, %v677_v63, %v679_v11  ;;  %v681_v60 = vsel %vm1856_vm13, %v675_v34, %v677_v63  ;;  %v662_v18 = vsel %vm1857_vm3, %v653_v61, %v655_v16  ;;  %v659_v20 = vpop.permute.xlu1 %658  ;;  %vm1868_vm14 = vcmp.ge.s32.totalorder %v1213_v57, 1  ;;  %vm1869_vm13 = vmmov %vm1867_vm4  ;;  %v33_v63 = vld [vmem:[%s1749_s2] sm:$0xff] }
 0x265   :  { %v663_v21 = vsel %vm1858_vm11, %v659_v20, %v653_v61  ;;  %966 = vmatpush.msk.msra.mxu0 %vm1859_vm5, %v662_v18  ;;  %973 = vmatpush.msk.msra.mxu1 %vm1860_vm9, %v681_v60  ;;  %vm1870_vm3 = vcmp.ge.s32.totalorder %v1205_v50, 1  ;;  %vm1871_vm11 = vmmov %vm1867_vm4  ;;  %vm1873_vm9 = vcmp.ge.s32.totalorder %v1172_v38, 1  ;;  %v567_v50 = vld [vmem:[%s1747_s8 + $0x8] sm:$0xff]  ;;  %v904_v60 = vstv %s1750_s0 }
 0x266   :  { %981 = vmatpush.msk.msra.mxu2 %vm1861_vm6, %v680_v17  ;;  %990 = vmatpush.msk.msra.mxu3 %vm1862_vm10, %v663_v21  ;;  %vm1872_vm5 = vmmov %vm1867_vm4  ;;  %vm1874_vm6 = vcmp.ge.s32.totalorder %v1178_v42, 1  ;;  %vm1875_vm10 = vcmp.lt.s32.totalorder %v1164_v29, 15 }
 0x267   :  { %797 = vmatpush.msra.mxu0 %v1491_v31  ;;  %777 = vperm.xlu1 %1005, %v567_v50  }
 0x268   :  { %866 = vmatpush.msra.mxu3 %v1507_v26 }
 0x26b   :  { %v611_v7 = vpop.permute.xlu0 %610  ;;  %v595_v57 = vpop.permute.xlu2 %594 }
 0x26c   :  { %v657_v22 = vpop.permute.xlu1 %656 }
 0x26d   :  { %v660_v25 = vsel %vm1863_vm0, %v657_v22, %v659_v20  ;;  %v661_v14 = vsel %vm1864_vm7, %v655_v16, %v657_v22  ;;  %vm1876_vm0 = vmmov %vm1875_vm10  ;;  %vm1877_vm7 = vnez %v1806_v27 }
 0x26e   :  { %974 = vmatpush.msk.msra.mxu1 %vm1865_vm8, %v661_v14  ;;  %982 = vmatpush.msk.msra.mxu2 %vm1866_vm2, %v660_v25  ;;  %vm1878_vm8 = vnez %v1809_v35  ;;  %vm1879_vm2 = vcmp.lt.s32.totalorder %v1164_v29, 16 }
 0x26f   :  { %vm1880_vm4 = vmmov %vm1879_vm2 }
 0x270   :  { %820 = vmatpush.msra.mxu1 %v1493_v24  ;;  %843 = vmatpush.msra.mxu2 %v1527_v23 }
 0x272   :  { %975 = vmatpush.msk.msra.mxu1 %vm1868_vm14, %v638_v9  ;;  %vm1881_vm14 = vcmp.ge.s32.totalorder %v1170_v37, 1 }
 0x273   :  { %v591_v10 = vpop.permute.xlu0 %590  ;;  %v575_v34 = vpop.permute.xlu2 %574 }
 0x274   :  { %v635_v31 = vpop.permute.xlu1 %634 }
 0x275   :  { %v639_v19 = vsel %vm1869_vm13, %v635_v31, %v629_v55  ;;  %vm1882_vm13 = vcmp.ge.s32.totalorder %v1176_v41, 1 }
 0x276   :  { %967 = vmatpush.msk.msra.mxu0 %vm1870_vm3, %v639_v19  ;;  %vm1883_vm3 = vmmov %vm1876_vm0 }
 0x27b   :  { %v633_v26 = vpop.permute.xlu0 %632  ;;  %v569_v44 = vpop.permute.xlu2 %568 }
 0x27c   :  { %v636_v24 = vsel %vm1871_vm11, %v633_v26, %v635_v31  ;;  %v637_v28 = vsel %vm1872_vm5, %v1566_v36, %v633_v26  ;;  %v615_v15 = vpop.permute.xlu1 %614  ;;  %vm1884_vm11 = vmmov %vm1876_vm0  ;;  %vm1885_vm5 = vcmp.lt.s32.totalorder %v1164_v29, 17 }
 0x27d   :  { %983 = vmatpush.msk.msra.mxu2 %vm1873_vm9, %v637_v28  ;;  %991 = vmatpush.msk.msra.mxu3 %vm1874_vm6, %v636_v24  ;;  %vm1886_vm9 = vmmov %vm1885_vm5  ;;  %vm1887_vm6 = vnez %v1822_v54 }
 0x283   :  { %v613_v30 = vpop.permute.xlu0 %612 }
 0x284   :  { %v616_v23 = vsel %vm1875_vm10, %v613_v30, %v615_v15  ;;  %v617_v32 = vsel %vm1876_vm0, %v611_v7, %v613_v30  ;;  %v593_v33 = vpop.permute.xlu1 %592  ;;  %vm1888_vm10 = vnez %v1815_v51  ;;  %vm1889_vm0 = vnez %v1819_v52 }
 0x285   :  { %984 = vmatpush.msk.msra.mxu2 %vm1877_vm7, %v617_v32  ;;  %992 = vmatpush.msk.msra.mxu3 %vm1878_vm8, %v616_v23  ;;  %v596_v38 = vsel %vm1879_vm2, %v593_v33, %v595_v57  ;;  %v597_v42 = vsel %vm1880_vm4, %v591_v10, %v593_v33  ;;  %vm1890_vm7 = vcmask 588800   ;;  %vm1893_vm4 = vcmp.ge.s32.totalorder %v1203_v49, 1 }
 0x286   :  { %vm1891_vm8 = vmmov %vm1890_vm7 }
 0x287   :  { %985 = vmatpush.msk.msra.mxu2 %vm1881_vm14, %v597_v42  ;;  %993 = vmatpush.msk.msra.mxu3 %vm1882_vm13, %v596_v38  ;;  %vm1894_vm14 = vcmp.ge.s32.totalorder %v1211_v56, 1  ;;  %vm1895_vm13 = vmmov %vm1885_vm5 }
 0x288   :  { %v578_v52 = vsel %vm1895_vm13, %v569_v44, %v1568_v39 }
 0x28b   :  { %v609_v36 = vpop.permute.xlu0 %608 }
 0x28c   :  { %v618_v27 = vsel %vm1883_vm3, %v609_v36, %v611_v7  ;;  %v619_v35 = vsel %vm1884_vm11, %v615_v15, %v609_v36  ;;  %v573_v40 = vpop.permute.xlu1 %572  ;;  %vm1896_vm3 = vmmov %vm1885_vm5 }
 0x28d   :  { %v576_v37 = vsel %vm1885_vm5, %v573_v40, %v575_v34  ;;  %v577_v41 = vsel %vm1886_vm9, %v1568_v39, %v573_v40  ;;  %968 = vmatpush.msk.msra.mxu0 %vm1404_vm15, %v619_v35  ;;  %976 = vmatpush.msk.msra.mxu1 %vm1887_vm6, %v618_v27  ;;  %vm1892_vm15 = vmmov %vm1879_vm2  ;;  %v579_v53 = vsel %vm1896_vm3, %v575_v34, %v569_v44 }
 0x28e   :  { %986 = vmatpush.msk.msra.mxu2 %vm1888_vm10, %v577_v41  ;;  %994 = vmatpush.msk.msra.mxu3 %vm1889_vm0, %v576_v37  ;;  %vm1897_vm11 = vmmov %vm1890_vm7 }
 0x28f   :  { %927 = vmatmul.msk.f32.vlgmr.msra.gmra.mxu2 %vm1890_vm7, %v732_v43  ;;  %929 = vmatmul.msk.f32.vlgmr.msra.gmra.mxu3 %vm1891_vm8, %v732_v43  ;;  %vm1898_vm5 = vmmov %vm1890_vm7 }
 0x290   :  { %vm1899_vm9 = vmmov %vm1898_vm5 }
 0x291   :  { %vm1900_vm6 = vmmov %vm1898_vm5 }
 0x292   :  { %vm1901_vm10 = vmmov %vm1898_vm5 }
 0x293   :  { %vm1902_vm0 = vmmov %vm1898_vm5  ;;  %v773_v29 = vpop.permute.xlu0 %772 }
 0x294   :  { %v589_v46 = vpop.permute.xlu1 %588 }
 0x295   :  { %v598_v54 = vsel %vm1892_vm15, %v589_v46, %v591_v10  ;;  %v599_v51 = vsel %vm1879_vm2, %v595_v57, %v589_v46 }
 0x296   :  { %969 = vmatpush.msk.msra.mxu0 %vm1893_vm4, %v599_v51  ;;  %977 = vmatpush.msk.msra.mxu1 %vm1894_vm14, %v598_v54 }
 0x297   :  { %930 = vmatmul.msk.f32.gmra.mxu3 %vm1897_vm11, %v733_v45  ;;  %928 = vmatmul.msk.f32.gmra.mxu2 %vm1898_vm5, %v733_v45 }
 0x298   :  { %970 = vmatpush.msk.msra.mxu0 %vm1460_vm12, %v579_v53  ;;  %978 = vmatpush.msk.msra.mxu1 %vm1472_vm1, %v578_v52  ;;  %vm885_vm12 = vcmask 1043456  }
 0x299   :  { %923 = vmatmul.msk.f32.vlgmr.msra.gmra.mxu0 %vm1899_vm9, %v732_v43  ;;  %925 = vmatmul.msk.f32.vlgmr.msra.gmra.mxu1 %vm1900_vm6, %v732_v43 }
 0x2a1   :  { %924 = vmatmul.msk.f32.gmra.mxu0 %vm1901_vm10, %v733_v45  ;;  %926 = vmatmul.msk.f32.gmra.mxu1 %vm1902_vm0, %v733_v45 }
 0x2d9   :  { %v778_v62 = vpop.permute.xlu1 %777 }
 0x312   :  { %v849_v49 = vpop.f32.mrf.mxu2  ;;  %v872_v56 = vpop.f32.mrf.mxu3 }
 0x313   :  { %v873_v39 = vadd.f32 %v872_v56, %v773_v29  ;;  %v850_v8 = vadd.f32 %v849_v49, %v773_v29 }
 0x315   :  { %v884_v61 = vrot.slane %v873_v39, 4 }
 0x316   :  { %v803_v55 = vpop.f32.mrf.mxu0  ;;  %v826_v58 = vpop.f32.mrf.mxu1 }
 0x317   :  { %v827_v4 = vadd.f32 %v826_v58, %v773_v29  ;;  %v887_v3 = vsel %vm885_vm12, %v850_v8, %v884_v61  ;;  %v804_v11 = vadd.f32 %v803_v55, %v773_v29 }
 0x318   :  { %v891_v47 = vmul.f32 %v887_v3, %v34_v2 }
 0x319   :  { %v883_v48 = vrot.slane %v827_v4, 4 }
 0x31a   :  { %v875_v0 = vpop.f32.mrf.mxu3  ;;  %v852_v1 = vpop.f32.mrf.mxu2 }
 0x31b   :  { %v876_v5 = vadd.f32 %v875_v0, %v778_v62  ;;  %v853_v6 = vadd.f32 %v852_v1, %v778_v62  ;;  %v886_v16 = vsel %vm885_vm12, %v804_v11, %v883_v48 }
 0x31c   :  { %v890_v22 = vmul.f32 %v886_v16, %v33_v63 }
 0x31d   :  { %v897_v12 = vrot.slane %v876_v5, 4 }
 0x31e   :  { %v806_v13 = vpop.f32.mrf.mxu0  ;;  %v829_v59 = vpop.f32.mrf.mxu1 }
 0x31f   :  { %v899_v17 = vsel %vm885_vm12, %v853_v6, %v897_v12  ;;  %v830_v18 = vadd.f32 %v829_v59, %v778_v62  ;;  %v807_v21 = vadd.f32 %v806_v13, %v778_v62 }
 0x320   :  { %v903_v20 = vadd.f32 %v899_v17, %v891_v47 }
 0x321   :  { %v896_v7 = vrot.slane %v830_v18, 4 }
 0x322   :  { %v906_v25 = vmul.f32 %v904_v60, %v903_v20 }
 0x323   :  { %v898_v14 = vsel %vm885_vm12, %v807_v21, %v896_v7 }
 0x324   :  { %v908_v9 = vadd.f32 %v906_v25, %v34_v2  ;;  %v902_v10 = vadd.f32 %v898_v14, %v890_v22 }
 0x326   :  { %910 = vst [vmem:[%s1751_s9 + $0x8] sm:$0xff] %v908_v9  ;;  %v905_v31 = vmul.f32 %v904_v60, %v902_v10 }
 0x328   :  { %v907_v19 = vadd.f32 %v905_v31, %v33_v63 }
 0x32a   :  { %909 = vst [vmem:[%s1751_s9] sm:$0xff] %v907_v19 }

</bundles_post_ra>
